<compile_context>
chip_gen: v5e
topology: v5e:2x2
jax: 0.10.0
libtpu: 0.0.40
codegen_flags: <defaults>
</compile_context>

<pallas_src>
import functools

import jax
import jax.numpy as jnp
from jax.experimental import pallas as pl
from jax.experimental.pallas import tpu as pltpu


def _round_up(x, m):
    return ((x + m - 1) // m) * m


def _matcomp_kernel(x_ref, w1t_ref, w2t_ref, o_ref, *, compute_dtype):
    # Hot path: two chained MXU matmuls, f32 accumulation.
    xb = x_ref[...].astype(compute_dtype)
    h = jnp.dot(xb, w1t_ref[...], preferred_element_type=jnp.float32)
    o_ref[...] = jnp.dot(h.astype(compute_dtype), w2t_ref[...],
                         preferred_element_type=jnp.float32).astype(o_ref.dtype)


def _choose_tile_m(M, tile_m):
    """Pick a row-tile that is (8,)-aligned, amortizes per-step overhead, and
    gives >=2 grid steps when possible (feeds both TensorCores on v7x)."""
    tile_m = max(8, (tile_m // 8) * 8)
    if M > tile_m:
        return tile_m
    if M >= 16:
        return _round_up(pl.cdiv(M, 2), 8)   # split into two tiles
    return M                                  # tiny: single full-extent tile


def _estimate_vmem_bytes(tm, d_in, dp, x_itemsize, w_itemsize, out_itemsize):
    x_tiles = 2 * tm * d_in * x_itemsize          # double-buffered x tiles
    out_tiles = 2 * tm * dp * out_itemsize        # double-buffered out tiles
    weights = 2 * (d_in * dp + dp * dp) * w_itemsize
    interm = tm * dp * 4 + tm * dp * w_itemsize + tm * d_in * w_itemsize
    return x_tiles + out_tiles + weights + interm


def matrix_completion_forward(x, w1, w2, *, tile_m=1024, compute_dtype=jnp.bfloat16):
    """x: [..., d_in]; w1: [d_out, d_in]; w2: [d_out, d_out] (PyTorch Linear weight layout).

    Computes (x @ w1.T) @ w2.T, matching nn.Linear(bias=False) twice.
    """
    orig_shape = x.shape
    d_in = orig_shape[-1]
    d_out = w1.shape[0]
    x2d = x.reshape(-1, d_in)
    M = x2d.shape[0]

    # Lane-dense padded output width (multiple of 128 lanes).
    dp = _round_up(d_out, 128)

    # Weight prep: transpose + zero-pad columns/rows to the padded width + cast to the
    # MXU compute dtype.  Done once per call here; in a real model hoist to init time.
    w_dt = jnp.dtype(compute_dtype)
    w1t_p = jnp.zeros((d_in, dp), w_dt).at[:, :d_out].set(w1.T.astype(w_dt))
    w2t_p = jnp.zeros((dp, dp), w_dt).at[:d_out, :d_out].set(w2.T.astype(w_dt))

    out_dtype = x.dtype
    x_isz = jnp.dtype(x.dtype).itemsize
    w_isz = w_dt.itemsize
    o_isz = jnp.dtype(out_dtype).itemsize

    # Tile-size selection against a VMEM budget that is safe on v5e/v6e (128 MiB)
    # and v7x (64 MiB).
    VMEM_BUDGET = 48 * 1024 * 1024
    tm = _choose_tile_m(M, tile_m)
    while tm > 256 and _estimate_vmem_bytes(tm, d_in, dp, x_isz, w_isz, o_isz) > VMEM_BUDGET:
        tm //= 2
    grid_m = pl.cdiv(M, tm)

    cost = pl.CostEstimate(
        flops=2 * M * d_in * dp + 2 * M * dp * dp,
        transcendentals=0,
        bytes_accessed=M * d_in * x_isz + (d_in * dp + dp * dp) * w_isz + M * dp * o_isz,
    )

    kernel = functools.partial(_matcomp_kernel, compute_dtype=compute_dtype)

    out2d = pl.pallas_call(
        kernel,
        out_shape=jax.ShapeDtypeStruct((M, dp), out_dtype),
        grid_spec=pltpu.PrefetchScalarGridSpec(
            num_scalar_prefetch=0,
            grid=(grid_m,),
            in_specs=[
                pl.BlockSpec((tm, d_in), lambda i: (i, 0)),   # x tile (pipelined over M)
                pl.BlockSpec((d_in, dp), lambda i: (0, 0)),   # W1^T padded (resident)
                pl.BlockSpec((dp, dp), lambda i: (0, 0)),     # W2^T padded (resident)
            ],
            out_specs=pl.BlockSpec((tm, dp), lambda i: (i, 0)),  # lane-dense output
        ),
        compiler_params=pltpu.CompilerParams(
            dimension_semantics=("parallel",),
            vmem_limit_bytes=VMEM_BUDGET,
        ),
        cost_estimate=cost,
    )(x2d, w1t_p, w2t_p)

    # Drop the lane padding and restore the original leading dims.
    return out2d[:, :d_out].reshape(*orig_shape[:-1], d_out)


if __name__ == "__main__":
    # input_shape=(..., 32), output_shape=(..., 32); batch=2, seq=8.
    batch, seq, d_in, d_out = 2, 8, 32, 32

    key = jax.random.PRNGKey(0)
    kx, k1, k2 = jax.random.split(key, 3)

    x = jax.random.normal(kx, (batch, seq, d_in), dtype=jnp.float32)
    # Deterministic Linear weights (PyTorch layout: [out_features, in_features]).
    w1 = jax.random.normal(k1, (d_out, d_in), dtype=jnp.float32) * (1.0 / jnp.sqrt(d_in))
    w2 = jax.random.normal(k2, (d_out, d_out), dtype=jnp.float32) * (1.0 / jnp.sqrt(d_out))

    out = matrix_completion_forward(x, w1, w2)
    out = jax.block_until_ready(out)

    # Reference check against plain JAX f32 (same semantics as the PyTorch module).
    # Tolerance is loosened because the kernel feeds bf16 operands to the MXU
    # (f32 accumulation), per the v6e/v7x performance guidance.
    ref = (x @ w1.T) @ w2.T
    assert out.shape == (batch, seq, d_out)
    assert jnp.allclose(out, ref, atol=5e-2, rtol=5e-2), float(jnp.max(jnp.abs(out - ref)))

    print("KERNEL_OK")
</pallas_src>

<mosaic_0001>
module attributes {stable_mosaic.version = 11 : i64} {
  func.func @_matcomp_kernel(%arg0: i32, %arg1: memref<8x32xf32, #tpu.memory_space<vmem>>, %arg2: memref<32x128xbf16, #tpu.memory_space<vmem>>, %arg3: memref<128x128xbf16, #tpu.memory_space<vmem>>, %arg4: memref<8x128xf32, #tpu.memory_space<vmem>>) attributes {dimension_semantics = [#tpu.dimension_semantics<parallel>], iteration_bounds = array<i64: 2>, scalar_prefetch = 0 : i64, scratch_operands = 0 : i64, tpu.core_type = #tpu.core_type<tc>, window_params = [{transform_indices = @transform_0, window_bounds = array<i64: 8, 32>}, {pipeline_mode = #tpu.pipeline_mode<synchronous>, transform_indices = @transform_1, window_bounds = array<i64: 32, 128>}, {pipeline_mode = #tpu.pipeline_mode<synchronous>, transform_indices = @transform_2, window_bounds = array<i64: 128, 128>}, {transform_indices = @transform_3, window_bounds = array<i64: 8, 128>}]} {
    %c0 = arith.constant 0 : index
    %c0_0 = arith.constant 0 : index
    %0 = vector.load %arg1[%c0, %c0_0] : memref<8x32xf32, #tpu.memory_space<vmem>>, vector<8x32xf32>
    %1 = arith.truncf %0 : vector<8x32xf32> to vector<8x32xbf16>
    %c0_1 = arith.constant 0 : index
    %c0_2 = arith.constant 0 : index
    %2 = vector.load %arg2[%c0_1, %c0_2] : memref<32x128xbf16, #tpu.memory_space<vmem>>, vector<32x128xbf16>
    %cst = arith.constant dense<0.000000e+00> : vector<8x128xf32>
    %3 = tpu.matmul %1, %2, %cst {dimension_numbers = #tpu.dot_dimension_numbers<[1], [0], [0], [1], [0, 0, 1, 1], [], []>} : vector<8x32xbf16>, vector<32x128xbf16>, vector<8x128xf32> -> vector<8x128xf32>
    %4 = arith.truncf %3 : vector<8x128xf32> to vector<8x128xbf16>
    %c0_3 = arith.constant 0 : index
    %c0_4 = arith.constant 0 : index
    %5 = vector.load %arg3[%c0_3, %c0_4] : memref<128x128xbf16, #tpu.memory_space<vmem>>, vector<128x128xbf16>
    %cst_5 = arith.constant dense<0.000000e+00> : vector<8x128xf32>
    %6 = tpu.matmul %4, %5, %cst_5 {dimension_numbers = #tpu.dot_dimension_numbers<[1], [0], [0], [1], [0, 0, 1, 1], [], []>} : vector<8x128xbf16>, vector<128x128xbf16>, vector<8x128xf32> -> vector<8x128xf32>
    %c0_6 = arith.constant 0 : index
    %c0_7 = arith.constant 0 : index
    %7 = vector.load %arg4[%c0_6, %c0_7] : memref<8x128xf32, #tpu.memory_space<vmem>>, vector<8x128xf32>
    tpu.vector_store %arg4[%c0_6, %c0_7], %6 {strides = array<i32>} : memref<8x128xf32, #tpu.memory_space<vmem>>, vector<8x128xf32>,
    return
  }
  func.func @transform_0(%arg0: i32) -> (i32, i32) {
    %c0_i32 = arith.constant 0 : i32
    %c0_i32_0 = arith.constant 0 : i32
    return %arg0, %c0_i32 : i32, i32
  }
  func.func @transform_1(%arg0: i32) -> (i32, i32) {
    %c0_i32 = arith.constant 0 : i32
    %c0_i32_0 = arith.constant 0 : i32
    %c0_i32_1 = arith.constant 0 : i32
    return %c0_i32, %c0_i32_0 : i32, i32
  }
  func.func @transform_2(%arg0: i32) -> (i32, i32) {
    %c0_i32 = arith.constant 0 : i32
    %c0_i32_0 = arith.constant 0 : i32
    %c0_i32_1 = arith.constant 0 : i32
    return %c0_i32, %c0_i32_0 : i32, i32
  }
  func.func @transform_3(%arg0: i32) -> (i32, i32) {
    %c0_i32 = arith.constant 0 : i32
    %c0_i32_0 = arith.constant 0 : i32
    return %arg0, %c0_i32 : i32, i32
  }
}

</mosaic_0001>

<bundles_post_ra>
// kernel: tpu_custom_call.1
= control target key start
LH: loop header
LB: loop body
LE: loop exit
PB: predicated region body
PF: predicated region fallthrough
CT: control target
= control target key end

     0   :  { %8 = vsyncpa [#allocation3], 0  ;;  %s912_s0 = inlined_call_operand.hbm [shape: f32[16,32], index: 0, kind: input, shape index: {}]   ;;  %s913_s1 = inlined_call_operand.hbm [shape: bf16[32,128], index: 1, kind: input, shape index: {}]   ;;  %s914_s2 = inlined_call_operand.hbm [shape: bf16[128,128], index: 2, kind: input, shape index: {}]   ;;  %s915_s3 = inlined_call_operand.hbm [shape: f32[16,128], index: 3, kind: output, shape index: {}]  }
   0x1   :  { %10 = vsyncpa [#allocation3 + $0x1], 0 }
   0x2   :  { %11 = vsyncpa [#allocation6], 0 }
   0x3   :  { %12 = vsyncpa [#allocation4], 0 }
   0x4   :  { %14 = vsyncpa [#allocation4 + $0x1], 0  ;;  %s763_s12 = smov 0   ;;  %s765_s13 = smov 0  }
   0x5   :  { %s767_s14 = smov 0   ;;  %s769_s15 = smov 0  }
   0x6 LB: > { %s130_s18 = sshll.u32 %s913_s1, 4  ;;  %s787_s19 = sadd.s32 4294967295, %s737_s15   ;;  %s737_s15 = sphi %s769_s15, %s926_s15   ;;  %s733_s14 = sphi %s767_s14, %s925_s14   ;;  %s729_s13 = sphi %s765_s13, %s924_s13   ;;  %s725_s12 = sphi %s763_s12, %s923_s12   ;;  %s131_s18 = int_to_ptr.hbm [resolvable:$true] %s130_s18 }
   0x7   : > { %p442_p0 = scmp.ge.s32.totalorder %s737_s15, 1  ;;  %p41_p1 = scmp.eq.s32.totalorder %s787_s19, 0 }
   0x8   : > { %p119_p2 = scmp.lt.s32.totalorder %s737_s15, 3  ;;  %s739_s21 = smov [#allocation5]  }
   0x9   : > { %s132_s22 = sshll.u32 %s739_s21, 4  ;;  %s144_s25 = sshll.u32 %s914_s2, 4  ;;  %s133_s22 = int_to_ptr.vmem [resolvable:$true] %s132_s22  ;;  %s145_s25 = int_to_ptr.hbm [resolvable:$true] %s144_s25 }
   0xa   : > { %p792_p3 = pnand %p442_p0, %p119_p2  ;;  %s740_s26 = smov [#allocation7]  }
   0xb   : > { %s146_s27 = sshll.u32 %s740_s26, 4  ;;  %s741_s28 = smov 64   ;;  %s147_s27 = int_to_ptr.vmem [resolvable:$true] %s146_s27 }
   0xc   : > { %p520_p4 = pneg %p792_p3  ;;  %s742_s29 = smov 4  }
   0xd   : > { %s441_s30 = sadd.s32 4294967294, %s737_s15   ;;  %s806_s4 = sadd.s32 1, %s737_s15  }
   0xe   : > { %p521_p6 = pnand %p520_p4, %p41_p1  ;;  %s24_s5 = ssub.s32 %s737_s15, %s806_s4 }
   0xf   : > { %s27_s6 = sadd.s32 1, %s733_s14  ;;  %p25_p7 = scmp.eq.s32.totalorder %s24_s5, 0 }
  0x10   : > { %523 = dma.hbm_to_vmem [thread:$0]  (!%p521_p6), %s131_s18, 256, %s133_s22, [#allocation6], %s741_s28, %s741_s28, %s742_s29  }
  0x11   : > { %526 = dma.hbm_to_vmem [thread:$0]  (!%p521_p6), %s145_s25, 1024, %s147_s27, [#allocation6], %s741_s28, %s741_s28, %s742_s29  }
  0x12   : > { %p34_p8 = scmp.ne.s32.totalorder %s733_s14, %s729_s13  ;;  %p35_p9 = scmp.eq.s32.totalorder %s737_s15, 0 }
  0x13   : > { %p40_p10 = scmp.ne.s32.totalorder %s729_s13, %s725_s12  ;;  %p106_p13 = scmp.eq.s32.totalorder %s787_s19, 1 }
  0x14   : > { %s817_s7 = scalar_select %p25_p7, %s733_s14, %s27_s6  }
  0x15   : > { %p819_p11 = por %p35_p9, %p34_p8  ;;  %p825_p12 = por %p41_p1, %p40_p10 }
  0x16   : > { %p112_p0 = scmp.eq.s32.totalorder %s441_s30, 1  ;;  %p537_p2 = scmp.lt.s32.totalorder %s737_s15, 2 }
  0x17   : > { %s160_s10 = sand.u32 1, %s733_s14   ;;  %p832_p4 = por %p106_p13, %p34_p8 }
  0x18   : > { %p836_p6 = por %p112_p0, %p40_p10  ;;  %s446_s17 = sshll.u32 %s160_s10, 3 }
  0x19   : > { %s447_s18 = sshll.u32 %s737_s15, 3  ;;  %s164_s24 = scalar_lea.vmem [#allocation2], %s446_s17 }
  0x1a   : > { %s168_s23 = scalar_lea.hbm %s912_s0, %s447_s18  ;;  %s172_s25 = sshll.u32 %s164_s24, 4  ;;  %s173_s25 = int_to_ptr.vmem [resolvable:$true] %s172_s25 }
  0x1b   : > { %s170_s26 = sshll.u32 %s168_s23, 4  ;;  %p846_p7 = pnand %p537_p2, %p819_p11  ;;  %s171_s26 = int_to_ptr.hbm [resolvable:$true] %s170_s26 }
  0x1c   : > { %s161_s28 = scalar_lea.sflag [#allocation3], %s160_s10  ;;  %s637_s29 = sshra.s32 %s171_s26, 4  ;;  %s638_s29 = int_to_ptr.hbm [resolvable:$true] %s637_s29 }
  0x1d   : > { %s639_s30 = scalar_lea.hbm %s638_s29, 8  ;;  %p641_p9 = pneg %p846_p7 }
  0x1e   : > { %p640_p8 = scmp.ne.s32.totalorder %s638_s29, %s639_s30  ;;  %s644_s17 = scalar_lea.hbm %s912_s0, 16 }
  0x1f   : > { %p645_p11 = scmp.lt.s32.totalorder %s638_s29, %s912_s0  ;;  %p646_p0 = scmp.lt.s32.totalorder %s644_s17, %s639_s30 }
  0x20   : > { %p642_p10 = pnand %p641_p9, %p640_p8 }
  0x21   : > { %p647_p2 = por %p646_p0, %p645_p11 }
  0x22   : > { %p643_p13 = pneg %p642_p10 }
  0x24   : > { %p648_p5 = pnand %p647_p2, %p643_p13 }
  0x26   : > { %651 = shalt.err (!%p648_p5)
}
  0x27   : > { %530 = dma.hbm_to_vmem [thread:$0]  (!%p846_p7), %s171_s26, 128, %s173_s25, %s161_s28  }
  0x28   : > { %181 = sbr.rel (%p792_p3) target bundleno = 318 (0x13e), region = 32  ;;  %s863_s10 = sand.u32 (!%p792_p3), 1, %s729_s13  }
  0x29   : > { %s449_s21 = sshll.u32 (!%p792_p3), %s863_s10, 3  ;;  %s184_s22 = scalar_lea.sflag (!%p792_p3), [#allocation3], %s863_s10 }
  0x2a   : > { %s187_s23 = scalar_lea.vmem (!%p792_p3), [#allocation2], %s449_s21 }
  0x2d   : > { %712 = dma.done.wait (%p825_p12), %s184_s22, 128  }
  0x2e   : > { %714 = vsyncadd (%p825_p12), %s184_s22, 4294967168 }
  0x2f   : > { %716 = dma.done.wait (%p41_p1), [#allocation6], 1280  }
  0x30   : > { %718 = vsyncadd (%p41_p1), [#allocation6], 4294966016  ;;  %v499_v0 = vld [vmem:[#allocation5 + $0x8] sm:$0xff]  ;;  %v498_v2 = vld [vmem:[#allocation5] sm:$0xff]  ;;  %vm240_vm0 = vcmask 261120   ;;  %s495_s20 = sshll.u32 %s787_s19, 3 }
  0x31   : > { %v507_v1 = vld [vmem:[#allocation7 + $0x38] sm:$0xff]  ;;  %250 = vmatpush.bf16.msra.mxu0 %v499_v0  ;;  %v222_v3 = vld [vmem:[%s187_s23] sm:$0xff]  ;;  %v506_v4 = vld [vmem:[#allocation7 + $0x30] sm:$0xff]  ;;  %s347_s25 = scalar_lea.hbm %s915_s3, %s495_s20  ;;  %s220_s26 = scalar_lea.vmem [#allocation8], %s449_s21 }
  0x32   : > { %322 = vmatpush.bf16.msra.mxu1 %v507_v1  ;;  %v223_v5 = vpack.c.bf16 %v222_v3, %v222_v3  ;;  %v505_v6 = vld [vmem:[#allocation7 + $0x28] sm:$0xff]  ;;  %v504_v7 = vld [vmem:[#allocation7 + $0x20] sm:$0xff]  ;;  %v503_v8 = vld [vmem:[#allocation7 + $0x18] sm:$0xff]  ;;  %s349_s27 = sshll.u32 %s220_s26, 4  ;;  %s351_s28 = sshll.u32 %s347_s25, 4  ;;  %s350_s27 = int_to_ptr.vmem [resolvable:$true] %s349_s27  ;;  %s352_s28 = int_to_ptr.hbm [resolvable:$true] %s351_s28 }
  0x33   : > { %v502_v9 = vld [vmem:[#allocation7 + $0x10] sm:$0xff]  ;;  %v501_v10 = vld [vmem:[#allocation7 + $0x8] sm:$0xff]  ;;  %v500_v11 = vld [vmem:[#allocation7] sm:$0xff]  ;;  %s337_s29 = scalar_lea.sflag [#allocation4], %s863_s10  ;;  %s681_s30 = sshra.s32 %s352_s28, 4  ;;  %s682_s30 = int_to_ptr.hbm [resolvable:$true] %s681_s30 }
  0x34   : > { %s683_s5 = scalar_lea.hbm %s682_s30, 8  ;;  %s687_s17 = scalar_lea.hbm %s915_s3, 16 }
  0x35   : > { %251 = vmatpush.bf16.msra.mxu0 %v498_v2  ;;  %p684_p1 = scmp.ne.s32.totalorder %s682_s30, %s683_s5  ;;  %p688_p12 = scmp.lt.s32.totalorder %s682_s30, %s915_s3 }
  0x36   : > { %323 = vmatpush.bf16.msra.mxu1 %v506_v4  ;;  %p689_p7 = scmp.lt.s32.totalorder %s687_s17, %s683_s5 }
  0x37   : > { %p685_p3 = pnand %p684_p1, %p832_p4 }
  0x38   : > { %461 = vmatmul.msk.bf16.vlgmr.msra.gmra.mxu0 %vm240_vm0, %v223_v5  ;;  %p690_p8 = por %p689_p7, %p688_p12 }
  0x39   : > { %p686_p5 = pneg %p685_p3 }
  0x3a   : > { %324 = vmatpush.bf16.msra.mxu1 %v505_v6 }
  0x3b   : > { %p691_p9 = pnand %p690_p8, %p686_p5 }
  0x3e   : > { %325 = vmatpush.bf16.msra.mxu1 %v504_v7 }
  0x42   : > { %326 = vmatpush.bf16.msra.mxu1 %v503_v8 }
  0x46   : > { %327 = vmatpush.bf16.msra.mxu1 %v502_v9 }
  0x4a   : > { %328 = vmatpush.bf16.msra.mxu1 %v501_v10 }
  0x4e   : > { %329 = vmatpush.bf16.msra.mxu1 %v500_v11 }
  0xb5   : > { %v253_v12 = vpop.f32.mrf.mxu0 }
  0xb6   : > { %v257_v13 = vpack.c.bf16 %v253_v12, %v253_v12 }
  0xb8   : > { %330 = vmatmul.bf16.vlgmr.msra.gmra.mxu1 %v257_v13 }
  0xbd   : > { %v255_v14 = vpop.f32.mrf.mxu0 }
 0x135   : > { %v331_v15 = vpop.f32.mrf.mxu1 }
 0x136   : > { %335 = vst [vmem:[%s220_s26] sm:$0xff] %v331_v15 }
 0x137   : > { %694 = shalt.err (!%p691_p9)
}
 0x138   : > { %518 = dma.vmem_to_hbm [thread:$0]  (%p832_p4), %s350_s27, 128, %s352_s28, %s337_s29  }
 0x13d   : > { %v333_v16 = vpop.f32.mrf.mxu1 }
 0x13e PF: > { %s363_s10 = sand.u32 1, %s725_s12   ;;  %p922_p10 = scmp.ge.s32.totalorder %s737_s15, 2 }
 0x13f   : > { %s364_s21 = scalar_lea.sflag [#allocation4], %s363_s10 }
 0x140   : > { %p532_p13 = pnand %p922_p10, %p836_p6 }
 0x142   : > { %p533_p11 = pneg %p532_p13 }
 0x144   : > { %720 = dma.done.wait (%p533_p11), %s364_s21, 128  }
 0x145   : > { %722 = vsyncadd (%p533_p11), %s364_s21, 4294967168  ;;  %p17_p0 = scmp.ge.s32.totalorder %s806_s4, 4   ;;  %s923_s12 = smov %s729_s13 }
 0x146   : > { %s924_s13 = smov %s733_s14  ;;  %s925_s14 = smov %s817_s7 }
 0x147   : > { %s926_s15 = smov %s806_s4  ;;  %19 = sbr.rel (!%p17_p0) target bundleno = 6 (0x6), region = 85 }
 0x14c   :  { %370 = vsyncpa [#allocation3], 1 }
 0x14d   :  { %372 = vsyncpa [#allocation3 + $0x1], 1 }
 0x14e   :  { %373 = vsyncpa [#allocation6], 1 }
 0x14f   :  { %374 = vsyncpa [#allocation4], 1 }
 0x150   :  { %376 = vsyncpa [#allocation4 + $0x1], 1 }

</bundles_post_ra>
